<compile_context>
chip_gen: v7x
topology: tpu7x:2x2x1
jax: 0.10.0
libtpu: 0.0.40
codegen_flags: <defaults>
</compile_context>

<pallas_src>
import jax
import jax.numpy as jnp
from jax.experimental import pallas as pl
from jax.experimental.pallas import tpu as pltpu


def _round_up(x, m):
    return ((x + m - 1) // m) * m


def highway_kernel(x_ref, wnl_ref, wg_ref, bnl_ref, bg_ref, o_ref):
    # x_ref: [TB, H]; wnl_ref/wg_ref: [H, H]; bnl_ref/bg_ref: [1, H]; o_ref: [TB, H]
    x = x_ref[...]
    xf = x.astype(jnp.float32)

    # Two H x H matmuls on the MXU, f32 accumulation.
    nonlinear = jnp.dot(x, wnl_ref[...], preferred_element_type=jnp.float32)
    nonlinear = nonlinear + bnl_ref[...]
    gate_logits = jnp.dot(x, wg_ref[...], preferred_element_type=jnp.float32)
    gate_logits = gate_logits + bg_ref[...]

    nonlinear = jnp.maximum(nonlinear, 0.0)     # ReLU   (VPU)
    gate = jax.nn.sigmoid(gate_logits)          # Sigmoid (exp/recip on EUP)

    # gate*x + (1-gate)*relu(nl)  ==  nl + gate*(x - nl)   (one fewer vmul)
    o_ref[...] = (nonlinear + gate * (xf - nonlinear)).astype(o_ref.dtype)


def prepare_highway_params(weight, bias):
    """weight: [2H, H] (PyTorch nn.Linear layout), bias: [2H].

    Precomputes (once, outside the per-call path) the transposed and split
    parameters: W_nl^T, W_gate^T as [H, H] and the two biases as [1, H] f32.
    """
    two_h, H = weight.shape
    assert two_h == 2 * H and bias.shape == (2 * H,)
    w_nl_t = jnp.asarray(weight[:H].T)                                  # [H, H]
    w_g_t = jnp.asarray(weight[H:].T)                                   # [H, H]
    b_nl = jnp.asarray(bias[:H], dtype=jnp.float32).reshape(1, H)       # [1, H]
    b_g = jnp.asarray(bias[H:], dtype=jnp.float32).reshape(1, H)        # [1, H]
    return w_nl_t, w_g_t, b_nl, b_g


def highway_forward(x, w_nl_t, w_g_t, b_nl, b_g, *, tile_b=256,
                    compute_dtype=None):
    """x: [B, H] (flatten any leading dims before calling). Returns [B, H].

    compute_dtype: optional dtype (e.g. jnp.bfloat16) for the matmul operands
    (x and W) on v6e/v7x; accumulation and elementwise math stay in f32.
    """
    B, H = x.shape
    out_dtype = x.dtype

    if compute_dtype is not None:
        x = x.astype(compute_dtype)
        w_nl_t = w_nl_t.astype(compute_dtype)
        w_g_t = w_g_t.astype(compute_dtype)

    # Row tile: a multiple of 16 covers both f32 (8-sublane) and bf16 (16-row)
    # packing; clamp to the (rounded-up) batch so tiny batches still work.
    tile_b = _round_up(max(16, min(tile_b, _round_up(B, 16))), 16)
    b_pad = _round_up(B, tile_b)
    if b_pad != B:
        x = jnp.pad(x, ((0, b_pad - B), (0, 0)))
    grid = (b_pad // tile_b,)

    def _itemsize(a):
        return jnp.dtype(a.dtype).itemsize

    cost = pl.CostEstimate(
        flops=4 * b_pad * H * H + 6 * b_pad * H,
        transcendentals=b_pad * H,
        bytes_accessed=(x.size * _itemsize(x)
                        + (w_nl_t.size + w_g_t.size) * _itemsize(w_nl_t)
                        + (b_nl.size + b_g.size) * 4
                        + b_pad * H * jnp.dtype(out_dtype).itemsize),
    )

    def call(single_buffer_consts):
        # Grid-invariant operands: single-buffer to halve their VMEM footprint
        # (matters most on v7x's 64 MiB VMEM / 32 MiB default scoped limit).
        const_kw = ({"pipeline_mode": pl.Buffered(buffer_count=1)}
                    if single_buffer_consts else {})
        # NOTE: for very large H the full [H, H] weight blocks may require
        # raising vmem_limit_bytes or adding an N-tiling grid axis; at ELMo
        # sizes (H = n_filters ~ 128-2048) they are small.
        return pl.pallas_call(
            highway_kernel,
            out_shape=jax.ShapeDtypeStruct((b_pad, H), out_dtype),
            grid_spec=pltpu.PrefetchScalarGridSpec(
                num_scalar_prefetch=0,
                grid=grid,
                in_specs=[
                    pl.BlockSpec((tile_b, H), lambda i: (i, 0)),          # x tile
                    pl.BlockSpec((H, H), lambda i: (0, 0), **const_kw),   # W_nl^T
                    pl.BlockSpec((H, H), lambda i: (0, 0), **const_kw),   # W_gate^T
                    pl.BlockSpec((1, H), lambda i: (0, 0), **const_kw),   # b_nl
                    pl.BlockSpec((1, H), lambda i: (0, 0), **const_kw),   # b_gate
                ],
                out_specs=pl.BlockSpec((tile_b, H), lambda i: (i, 0)),
            ),
            compiler_params=pltpu.CompilerParams(
                dimension_semantics=("parallel",),
            ),
            cost_estimate=cost,
        )(x, w_nl_t, w_g_t, b_nl, b_g)

    try:
        out = call(single_buffer_consts=True)
    except Exception:
        # pl.Buffered(1) not supported by this JAX build; use default buffering.
        out = call(single_buffer_consts=False)

    return out[:B]


def highway_reference(x, weight, bias):
    H = x.shape[-1]
    proj = (x.astype(jnp.float32) @ weight.T.astype(jnp.float32)
            + bias.astype(jnp.float32))
    nonlinear, gate_logits = proj[:, :H], proj[:, H:]
    nonlinear = jnp.maximum(nonlinear, 0.0)
    gate = jax.nn.sigmoid(gate_logits)
    return gate * x + (1.0 - gate) * nonlinear


if __name__ == "__main__":
    # config.n_filters = 128 (hidden size); small batch for the demo.
    B, H = 64, 128
    key = jax.random.PRNGKey(0)
    kx, kw, kb = jax.random.split(key, 3)

    x = jax.random.normal(kx, (B, H), dtype=jnp.float32)
    # PyTorch Linear(H, 2H) parameters: weight [2H, H], bias [2H].
    weight = jax.random.normal(kw, (2 * H, H), dtype=jnp.float32) * 0.05
    bias = jax.random.normal(kb, (2 * H,), dtype=jnp.float32) * 0.05

    params = prepare_highway_params(weight, bias)
    ref = highway_reference(x, weight, bias)

    # f32 path; tile_b=16 -> grid=(4,) so x/out DMAs pipeline across steps.
    out = jax.block_until_ready(highway_forward(x, *params, tile_b=16))
    assert out.shape == (B, H)
    assert jnp.allclose(out, ref, atol=1e-5, rtol=1e-5), "f32 mismatch vs reference"

    # bf16-matmul path (v6e/v7x MXU-friendly); accumulation/elementwise stay f32.
    out_bf16 = jax.block_until_ready(
        highway_forward(x, *params, tile_b=32, compute_dtype=jnp.bfloat16))
    assert out_bf16.shape == (B, H)
    assert jnp.allclose(out_bf16, ref, atol=3e-2, rtol=3e-2), "bf16 mismatch vs reference"

    print("KERNEL_OK")
</pallas_src>

<mosaic_0001>
module attributes {stable_mosaic.version = 11 : i64} {
  func.func @highway_kernel(%arg0: i32, %arg1: memref<16x128xf32, #tpu.memory_space<vmem>>, %arg2: memref<128x128xf32, #tpu.memory_space<vmem>>, %arg3: memref<128x128xf32, #tpu.memory_space<vmem>>, %arg4: memref<1x128xf32, #tpu.memory_space<vmem>>, %arg5: memref<1x128xf32, #tpu.memory_space<vmem>>, %arg6: memref<16x128xf32, #tpu.memory_space<vmem>>) attributes {dimension_semantics = [#tpu.dimension_semantics<parallel>], iteration_bounds = array<i64: 4>, scalar_prefetch = 0 : i64, scratch_operands = 0 : i64, tpu.core_type = #tpu.core_type<tc>, window_params = [{transform_indices = @transform_0, window_bounds = array<i64: 16, 128>}, {pipeline_mode = #tpu.pipeline_mode<synchronous>, transform_indices = @transform_1, window_bounds = array<i64: 128, 128>}, {pipeline_mode = #tpu.pipeline_mode<synchronous>, transform_indices = @transform_2, window_bounds = array<i64: 128, 128>}, {pipeline_mode = #tpu.pipeline_mode<synchronous>, transform_indices = @transform_3, window_bounds = array<i64: 1, 128>}, {pipeline_mode = #tpu.pipeline_mode<synchronous>, transform_indices = @transform_4, window_bounds = array<i64: 1, 128>}, {transform_indices = @transform_5, window_bounds = array<i64: 16, 128>}]} {
    %c0 = arith.constant 0 : index
    %c0_0 = arith.constant 0 : index
    %0 = vector.load %arg1[%c0, %c0_0] : memref<16x128xf32, #tpu.memory_space<vmem>>, vector<16x128xf32>
    %c0_1 = arith.constant 0 : index
    %c0_2 = arith.constant 0 : index
    %1 = vector.load %arg2[%c0_1, %c0_2] : memref<128x128xf32, #tpu.memory_space<vmem>>, vector<128x128xf32>
    %cst = arith.constant dense<0.000000e+00> : vector<16x128xf32>
    %2 = tpu.matmul %0, %1, %cst {dimension_numbers = #tpu.dot_dimension_numbers<[1], [0], [0], [1], [0, 0, 1, 1], [], []>} : vector<16x128xf32>, vector<128x128xf32>, vector<16x128xf32> -> vector<16x128xf32>
    %c0_3 = arith.constant 0 : index
    %c0_4 = arith.constant 0 : index
    %3 = vector.load %arg4[%c0_3, %c0_4] : memref<1x128xf32, #tpu.memory_space<vmem>>, vector<1x128xf32>
    %4 = vector.broadcast %3 : vector<1x128xf32> to vector<16x128xf32>
    %5 = arith.addf %2, %4 : vector<16x128xf32>
    %c0_5 = arith.constant 0 : index
    %c0_6 = arith.constant 0 : index
    %6 = vector.load %arg3[%c0_5, %c0_6] : memref<128x128xf32, #tpu.memory_space<vmem>>, vector<128x128xf32>
    %cst_7 = arith.constant dense<0.000000e+00> : vector<16x128xf32>
    %7 = tpu.matmul %0, %6, %cst_7 {dimension_numbers = #tpu.dot_dimension_numbers<[1], [0], [0], [1], [0, 0, 1, 1], [], []>} : vector<16x128xf32>, vector<128x128xf32>, vector<16x128xf32> -> vector<16x128xf32>
    %c0_8 = arith.constant 0 : index
    %c0_9 = arith.constant 0 : index
    %8 = vector.load %arg5[%c0_8, %c0_9] : memref<1x128xf32, #tpu.memory_space<vmem>>, vector<1x128xf32>
    %9 = vector.broadcast %8 : vector<1x128xf32> to vector<16x128xf32>
    %10 = arith.addf %7, %9 : vector<16x128xf32>
    %cst_10 = arith.constant 0.000000e+00 : f32
    %11 = vector.broadcast %cst_10 : f32 to vector<16x128xf32>
    %12 = arith.maximumf %5, %11 : vector<16x128xf32>
    %13 = arith.negf %10 : vector<16x128xf32>
    %14 = math.exp %13 : vector<16x128xf32>
    %cst_11 = arith.constant 1.000000e+00 : f32
    %15 = vector.broadcast %cst_11 : f32 to vector<16x128xf32>
    %16 = arith.addf %15, %14 : vector<16x128xf32>
    %17 = arith.divf %15, %16 : vector<16x128xf32>
    %18 = arith.subf %0, %12 : vector<16x128xf32>
    %19 = arith.mulf %17, %18 : vector<16x128xf32>
    %20 = arith.addf %12, %19 : vector<16x128xf32>
    %c0_12 = arith.constant 0 : index
    %c0_13 = arith.constant 0 : index
    %21 = vector.load %arg6[%c0_12, %c0_13] : memref<16x128xf32, #tpu.memory_space<vmem>>, vector<16x128xf32>
    tpu.vector_store %arg6[%c0_12, %c0_13], %20 {strides = array<i32>} : memref<16x128xf32, #tpu.memory_space<vmem>>, vector<16x128xf32>,
    return
  }
  func.func @transform_0(%arg0: i32) -> (i32, i32) {
    %c0_i32 = arith.constant 0 : i32
    %c0_i32_0 = arith.constant 0 : i32
    return %arg0, %c0_i32 : i32, i32
  }
  func.func @transform_1(%arg0: i32) -> (i32, i32) {
    %c0_i32 = arith.constant 0 : i32
    %c0_i32_0 = arith.constant 0 : i32
    %c0_i32_1 = arith.constant 0 : i32
    return %c0_i32, %c0_i32_0 : i32, i32
  }
  func.func @transform_2(%arg0: i32) -> (i32, i32) {
    %c0_i32 = arith.constant 0 : i32
    %c0_i32_0 = arith.constant 0 : i32
    %c0_i32_1 = arith.constant 0 : i32
    return %c0_i32, %c0_i32_0 : i32, i32
  }
  func.func @transform_3(%arg0: i32) -> (i32, i32) {
    %c0_i32 = arith.constant 0 : i32
    %c0_i32_0 = arith.constant 0 : i32
    %c0_i32_1 = arith.constant 0 : i32
    return %c0_i32, %c0_i32_0 : i32, i32
  }
  func.func @transform_4(%arg0: i32) -> (i32, i32) {
    %c0_i32 = arith.constant 0 : i32
    %c0_i32_0 = arith.constant 0 : i32
    %c0_i32_1 = arith.constant 0 : i32
    return %c0_i32, %c0_i32_0 : i32, i32
  }
  func.func @transform_5(%arg0: i32) -> (i32, i32) {
    %c0_i32 = arith.constant 0 : i32
    %c0_i32_0 = arith.constant 0 : i32
    return %arg0, %c0_i32 : i32, i32
  }
}

module attributes {stable_mosaic.version = 11 : i64} {
  func.func @highway_kernel(%arg0: i32, %arg1: memref<16x128xf32, #tpu.memory_space<vmem>>, %arg2: memref<128x128xf32, #tpu.memory_space<vmem>>, %arg3: memref<128x128xf32, #tpu.memory_space<vmem>>, %arg4: memref<1x128xf32, #tpu.memory_space<vmem>>, %arg5: memref<1x128xf32, #tpu.memory_space<vmem>>, %arg6: memref<16x128xf32, #tpu.memory_space<vmem>>) attributes {dimension_semantics = [#tpu.dimension_semantics<parallel>], iteration_bounds = array<i64: 4>, scalar_prefetch = 0 : i64, scratch_operands = 0 : i64, tpu.core_type = #tpu.core_type<tc>, window_params = [{transform_indices = @transform_0, window_bounds = array<i64: 16, 128>}, {pipeline_mode = #tpu.pipeline_mode<synchronous>, transform_indices = @transform_1, window_bounds = array<i64: 128, 128>}, {pipeline_mode = #tpu.pipeline_mode<synchronous>, transform_indices = @transform_2, window_bounds = array<i64: 128, 128>}, {pipeline_mode = #tpu.pipeline_mode<synchronous>, transform_indices = @transform_3, window_bounds = array<i64: 1, 128>}, {pipeline_mode = #tpu.pipeline_mode<synchronous>, transform_indices = @transform_4, window_bounds = array<i64: 1, 128>}, {transform_indices = @transform_5, window_bounds = array<i64: 16, 128>}]} {
    %c0 = arith.constant 0 : index
    %c0_0 = arith.constant 0 : index
    %0 = vector.load %arg1[%c0, %c0_0] : memref<16x128xf32, #tpu.memory_space<vmem>>, vector<16x128xf32>
    %c0_1 = arith.constant 0 : index
    %c0_2 = arith.constant 0 : index
    %1 = vector.load %arg2[%c0_1, %c0_2] : memref<128x128xf32, #tpu.memory_space<vmem>>, vector<128x128xf32>
    %cst = arith.constant dense<0.000000e+00> : vector<16x128xf32>
    %2 = tpu.matmul %0, %1, %cst {dimension_numbers = #tpu.dot_dimension_numbers<[1], [0], [0], [1], [0, 0, 1, 1], [], []>} : vector<16x128xf32>, vector<128x128xf32>, vector<16x128xf32> -> vector<16x128xf32>
    %c0_3 = arith.constant 0 : index
    %c0_4 = arith.constant 0 : index
    %3 = vector.load %arg4[%c0_3, %c0_4] : memref<1x128xf32, #tpu.memory_space<vmem>>, vector<1x128xf32>
    %4 = vector.broadcast %3 : vector<1x128xf32> to vector<16x128xf32>
    %5 = arith.addf %2, %4 : vector<16x128xf32>
    %c0_5 = arith.constant 0 : index
    %c0_6 = arith.constant 0 : index
    %6 = vector.load %arg3[%c0_5, %c0_6] : memref<128x128xf32, #tpu.memory_space<vmem>>, vector<128x128xf32>
    %cst_7 = arith.constant dense<0.000000e+00> : vector<16x128xf32>
    %7 = tpu.matmul %0, %6, %cst_7 {dimension_numbers = #tpu.dot_dimension_numbers<[1], [0], [0], [1], [0, 0, 1, 1], [], []>} : vector<16x128xf32>, vector<128x128xf32>, vector<16x128xf32> -> vector<16x128xf32>
    %c0_8 = arith.constant 0 : index
    %c0_9 = arith.constant 0 : index
    %8 = vector.load %arg5[%c0_8, %c0_9] : memref<1x128xf32, #tpu.memory_space<vmem>>, vector<1x128xf32>
    %9 = vector.broadcast %8 : vector<1x128xf32> to vector<16x128xf32>
    %10 = arith.addf %7, %9 : vector<16x128xf32>
    %cst_10 = arith.constant 0.000000e+00 : f32
    %11 = vector.broadcast %cst_10 : f32 to vector<16x128xf32>
    %12 = arith.maximumf %5, %11 : vector<16x128xf32>
    %13 = arith.negf %10 : vector<16x128xf32>
    %14 = math.exp %13 : vector<16x128xf32>
    %cst_11 = arith.constant 1.000000e+00 : f32
    %15 = vector.broadcast %cst_11 : f32 to vector<16x128xf32>
    %16 = arith.addf %15, %14 : vector<16x128xf32>
    %17 = arith.divf %15, %16 : vector<16x128xf32>
    %18 = arith.subf %0, %12 : vector<16x128xf32>
    %19 = arith.mulf %17, %18 : vector<16x128xf32>
    %20 = arith.addf %12, %19 : vector<16x128xf32>
    %c0_12 = arith.constant 0 : index
    %c0_13 = arith.constant 0 : index
    %21 = vector.load %arg6[%c0_12, %c0_13] : memref<16x128xf32, #tpu.memory_space<vmem>>, vector<16x128xf32>
    tpu.vector_store %arg6[%c0_12, %c0_13], %20 {strides = array<i32>} : memref<16x128xf32, #tpu.memory_space<vmem>>, vector<16x128xf32>,
    return
  }
  func.func @transform_0(%arg0: i32) -> (i32, i32) {
    %c0_i32 = arith.constant 0 : i32
    %c0_i32_0 = arith.constant 0 : i32
    return %arg0, %c0_i32 : i32, i32
  }
  func.func @transform_1(%arg0: i32) -> (i32, i32) {
    %c0_i32 = arith.constant 0 : i32
    %c0_i32_0 = arith.constant 0 : i32
    %c0_i32_1 = arith.constant 0 : i32
    return %c0_i32, %c0_i32_0 : i32, i32
  }
  func.func @transform_2(%arg0: i32) -> (i32, i32) {
    %c0_i32 = arith.constant 0 : i32
    %c0_i32_0 = arith.constant 0 : i32
    %c0_i32_1 = arith.constant 0 : i32
    return %c0_i32, %c0_i32_0 : i32, i32
  }
  func.func @transform_3(%arg0: i32) -> (i32, i32) {
    %c0_i32 = arith.constant 0 : i32
    %c0_i32_0 = arith.constant 0 : i32
    %c0_i32_1 = arith.constant 0 : i32
    return %c0_i32, %c0_i32_0 : i32, i32
  }
  func.func @transform_4(%arg0: i32) -> (i32, i32) {
    %c0_i32 = arith.constant 0 : i32
    %c0_i32_0 = arith.constant 0 : i32
    %c0_i32_1 = arith.constant 0 : i32
    return %c0_i32, %c0_i32_0 : i32, i32
  }
  func.func @transform_5(%arg0: i32) -> (i32, i32) {
    %c0_i32 = arith.constant 0 : i32
    %c0_i32_0 = arith.constant 0 : i32
    return %arg0, %c0_i32 : i32, i32
  }
}

</mosaic_0001>

<bundles_post_ra>
// kernel: tpu_custom_call.1
= control target key start
LH: loop header
LB: loop body
LE: loop exit
PB: predicated region body
PF: predicated region fallthrough
CT: control target
= control target key end

     0   :  { %10 = vsyncpa [#allocation3], 0  ;;  %s1322_s0 = inlined_call_operand.hbm [shape: f32[64,128], index: 0, kind: input, shape index: {}]   ;;  %s1323_s1 = inlined_call_operand.hbm [shape: f32[128,128], index: 1, kind: input, shape index: {}]   ;;  %s1324_s2 = inlined_call_operand.hbm [shape: f32[128,128], index: 2, kind: input, shape index: {}]   ;;  %s1325_s3 = inlined_call_operand.vmem [shape: f32[1,128], index: 3, kind: input, shape index: {}]   ;;  %s1326_s4 = inlined_call_operand.vmem [shape: f32[1,128], index: 4, kind: input, shape index: {}]   ;;  %s1327_s5 = inlined_call_operand.hbm [shape: f32[64,128], index: 5, kind: output, shape index: {}]  }
   0x1   :  { %12 = vsyncpa [#allocation3 + $0x1], 0 }
   0x2   :  { %13 = vsyncpa [#allocation6], 0 }
   0x3   :  { %14 = vsyncpa [#allocation4], 0 }
   0x4   :  { %16 = vsyncpa [#allocation4 + $0x1], 0  ;;  %s1069_s18 = smov 0   ;;  %s1071_s19 = smov 0  }
   0x5   :  { %s1073_s20 = smov 0   ;;  %s1075_s21 = smov 0  }
   0x6 LB: > { %s1090_s22 = sadd.s32 4294967295, %s1029_s21   ;;  %s600_s23 = sadd.s32 4294967294, %s1029_s21   ;;  %s1029_s21 = sphi %s1075_s21, %s1346_s21   ;;  %s1025_s20 = sphi %s1073_s20, %s1345_s20   ;;  %s1021_s19 = sphi %s1071_s19, %s1344_s19   ;;  %s1017_s18 = sphi %s1069_s18, %s1343_s18  }
   0x7   : > { %p42_p0 = scmp.ne.s32.totalorder %s1021_s19, %s1017_s18  ;;  %p1328_p1 = scmp.eq.s32.totalorder %s1090_s22, 0 }
   0x8   : > { %p156_p3 = scmp.eq.s32.totalorder %s600_s23, 3  ;;  %p601_p5 = scmp.ge.s32.totalorder %s1029_s21, 1 }
   0x9   : > { %p1099_p4 = por %p1328_p1, %p42_p0  ;;  %p163_p7 = scmp.lt.s32.totalorder %s1029_s21, 5 }
   0xa   : > { %p1104_p6 = por %p156_p3, %p42_p0  ;;  %s1031_s27 = smov [#allocation5]  }
   0xb   : > { %s1331_s24 = scalar_select %p1099_p4, 1, 0 }
   0xc   : > { %s1332_s25 = scalar_select %p1104_p6, 1, 0 }
   0xd   : > { %p1109_p8 = pnand %p601_p5, %p163_p7  ;;  %s175_s28 = sshll.u32 %s1031_s27, 4  ;;  %s176_s28 = int_to_ptr.vmem [resolvable:$true] %s175_s28 }
   0xe   : > { %s1032_s30 = smov [#allocation7]   ;;  %s873_s9 = scalar_lea.hbm %s1323_s1, 2048 }
   0xf   : > { %s1333_s26 = scalar_select %p1109_p8, 1, 0 }
  0x10   : > { %p806_p9 = pneg %p1109_p8  ;;  %s188_s6 = sshll.u32 %s1032_s30, 4  ;;  %s1121_s6 = int_to_ptr.vmem [resolvable:$true] %s188_s6 }
  0x11   : > { %p874_p11 = scmp.ne.s32.totalorder %s1323_s1, %s873_s9  ;;  %p880_p3 = scmp.lt.u32.totalorder %s873_s9, %s1323_s1 }
  0x12   : > { %p1117_p10 = pnand %p806_p9, %p1328_p1 }
  0x14   : > { %p875_p12 = pneg %p1117_p10 }
  0x16   : > { %p876_p13 = pnand %p875_p12, %p874_p11 }
  0x18   : > { %p877_p0 = pneg %p876_p13 }
  0x1a   : > { %p882_p5 = pnand %p880_p3, %p877_p0 }
  0x1c   : > { %885 = shalt.err (!%p882_p5)
}
  0x1d   : > { %s886_s14 = scalar_lea.vmem %s176_s28, 2048  ;;  %p894_p2 = scmp.lt.s32.totalorder %s176_s28, %s176_s28 }
  0x1e   : > { %p887_p7 = scmp.ne.s32.totalorder %s176_s28, %s886_s14  ;;  %p895_p6 = scmp.lt.s32.totalorder %s886_s14, %s886_s14 }
  0x20   : > { %p889_p9 = pnand %p887_p7, %p875_p12  ;;  %p896_p4 = por %p895_p6, %p894_p2 }
  0x22   : > { %p890_p1 = pneg %p889_p9 }
  0x24   : > { %p897_p8 = pnand %p896_p4, %p890_p1 }
  0x26   : > { %900 = shalt.err (!%p897_p8)
}
  0x27   : > { %s1033_s15 = smov 128   ;;  %s1034_s16 = smov 8  }
  0x28   : > { %809 = dma.hbm_to_vmem [thread:$0]  (!%p1117_p10), %s1323_s1, 2048, %s176_s28, [#allocation6], %s1033_s15, %s1033_s15, %s1034_s16  }
  0x29   : > { %s901_s7 = scalar_lea.hbm %s1324_s2, 2048 }
  0x2a   : > { %p902_p1 = scmp.ne.s32.totalorder %s1324_s2, %s901_s7  ;;  %p908_p6 = scmp.lt.u32.totalorder %s901_s7, %s1324_s2 }
  0x2c   : > { %p904_p2 = pnand %p902_p1, %p875_p12 }
  0x2e   : > { %p905_p4 = pneg %p904_p2 }
  0x30   : > { %p910_p8 = pnand %p908_p6, %p905_p4 }
  0x32   : > { %913 = shalt.err (!%p910_p8)
}
  0x33   : > { %s914_s28 = scalar_lea.vmem %s1121_s6, 2048  ;;  %p922_p3 = scmp.lt.s32.totalorder %s1121_s6, %s1121_s6 }
  0x34   : > { %p915_p11 = scmp.ne.s32.totalorder %s1121_s6, %s914_s28  ;;  %p923_p5 = scmp.lt.s32.totalorder %s914_s28, %s914_s28 }
  0x36   : > { %p917_p13 = pnand %p915_p11, %p875_p12  ;;  %p924_p7 = por %p923_p5, %p922_p3 }
  0x38   : > { %p918_p0 = pneg %p917_p13 }
  0x3a   : > { %p925_p9 = pnand %p924_p7, %p918_p0 }
  0x3c   : > { %928 = shalt.err (!%p925_p9)
}
  0x3d   : > { %812 = dma.hbm_to_vmem [thread:$0]  (!%p1117_p10), %s1324_s2, 2048, %s1121_s6, [#allocation6], %s1033_s15, %s1033_s15, %s1034_s16  }
  0x3e   : > { %s1177_s29 = sadd.s32 1, %s1029_s21   ;;  %s29_s14 = sadd.s32 1, %s1025_s20 }
  0x3f   : > { %s26_s17 = ssub.s32 %s1029_s21, %s1177_s29  ;;  %p36_p12 = scmp.ne.s32.totalorder %s1025_s20, %s1021_s19 }
  0x40   : > { %p27_p1 = scmp.eq.s32.totalorder %s26_s17, 0  ;;  %p37_p2 = scmp.eq.s32.totalorder %s1029_s21, 0 }
  0x41   : > { %p1335_p4 = scmp.eq.s32.totalorder %s1090_s22, 3  ;;  %p823_p8 = scmp.lt.s32.totalorder %s1029_s21, 4 }
  0x42   : > { %s1193_s27 = scalar_select %p27_p1, %s1025_s20, %s29_s14  }
  0x43   : > { %p1187_p6 = por %p1335_p4, %p36_p12  ;;  %p38_p11 = por %p37_p2, %p36_p12 }
  0x44   : > { %s208_s30 = sand.u32 1, %s1025_s20   ;;  %s622_s6 = sshll.u32 %s1029_s21, 8 }
  0x45   : > { %s605_s7 = sshll.u32 %s208_s30, 4  ;;  %s1200_s10 = scalar_lea.hbm %s1322_s0, %s622_s6 }
  0x46   : > { %s212_s11 = scalar_lea.vmem [#allocation2], %s605_s7  ;;  %p1204_p10 = pnand %p823_p8, %p38_p11 }
  0x47   : > { %s219_s28 = sshll.u32 %s212_s11, 4  ;;  %s1208_s13 = scalar_lea.sflag [#allocation3], %s208_s30  ;;  %s1202_s28 = int_to_ptr.vmem [resolvable:$true] %s219_s28 }
  0x48   : > { %s929_s14 = scalar_lea.hbm %s1200_s10, 256  ;;  %p931_p0 = pneg %p1204_p10 }
  0x49   : > { %p930_p13 = scmp.ne.s32.totalorder %s1200_s10, %s929_s14  ;;  %s934_s6 = scalar_lea.hbm %s1322_s0, 1024 }
  0x4a   : > { %p935_p7 = scmp.lt.u32.totalorder %s1200_s10, %s1322_s0  ;;  %p936_p9 = scmp.lt.u32.totalorder %s934_s6, %s929_s14 }
  0x4b   : > { %p932_p3 = pnand %p931_p0, %p930_p13  ;;  %p938_p1 = scmp.lt.u32.totalorder %s929_s14, %s1200_s10 }
  0x4c   : > { %p937_p12 = por %p936_p9, %p935_p7 }
  0x4d   : > { %p933_p5 = pneg %p932_p3 }
  0x4e   : > { %p939_p2 = por %p938_p1, %p937_p12 }
  0x50   : > { %p940_p4 = pnand %p939_p2, %p933_p5 }
  0x52   : > { %943 = shalt.err (!%p940_p4)
}
  0x53   : > { %s944_s30 = scalar_lea.vmem %s1202_s28, 256  ;;  %s1035_s11 = smov [#allocation2]  }
  0x54   : > { %p945_p8 = scmp.ne.s32.totalorder %s1202_s28, %s944_s30  ;;  %s949_s17 = sshll.u32 %s1035_s11, 4  ;;  %s950_s17 = int_to_ptr.vmem [resolvable:$false] %s949_s17 }
  0x55   : > { %s951_s7 = scalar_lea.vmem %s950_s17, 512  ;;  %p952_p3 = scmp.lt.s32.totalorder %s1202_s28, %s950_s17 }
  0x56   : > { %p947_p11 = pnand %p945_p8, %p931_p0  ;;  %p953_p7 = scmp.lt.s32.totalorder %s951_s7, %s944_s30 }
  0x58   : > { %p948_p13 = pneg %p947_p11  ;;  %p954_p9 = por %p953_p7, %p952_p3 }
  0x5a   : > { %p955_p12 = pnand %p954_p9, %p948_p13 }
  0x5c   : > { %958 = shalt.err (!%p955_p12)
}
  0x5d   : > { %816 = dma.hbm_to_vmem [thread:$0]  (!%p1204_p10), %s1200_s10, 256, %s1202_s28, %s1208_s13, %s1033_s15, %s1033_s15, %s1034_s16  }
  0x5e   : > { %p1338_p0 = scmp.ne.s32.totalorder %s1333_s26, 0 }
  0x5f   : > { %s1242_s14 = sand.u32 (!%p1338_p0), 1, %s1021_s19   ;;  %p1339_p5 = scmp.ne.s32.totalorder (!%p1338_p0), %s1331_s24, 0 }
  0x60   : > { %231 = sbr.rel (%p1338_p0) target bundleno = 402 (0x192), region = 40  ;;  %s609_s6 = sshll.u32 (!%p1338_p0), %s1242_s14, 4 }
  0x61   : > { %s234_s8 = scalar_lea.sflag (!%p1338_p0), [#allocation3], %s1242_s14  ;;  %s1248_s12 = scalar_lea.vmem (!%p1338_p0), [#allocation2], %s609_s6 }
  0x67   : > { %1004 = dma.done.wait (%p1339_p5), %s234_s8, 256  }
  0x68   : > { %1006 = vsyncadd (%p1339_p5), %s234_s8, 4294967040  ;;  %p1340_p10 = scmp.eq.s32.totalorder %s1090_s22, 0 }
  0x6a   : > { %1008 = dma.done.wait (%p1340_p10), [#allocation6], 4096   ;;  %p1341_p1 = pmov %p1340_p10 }
  0x6b   : > { %v374_v0 = vld [vmem:[#allocation7] sm:$0xff]  ;;  %v375_v1 = vld [vmem:[#allocation7 + $0x8] sm:$0xff]  ;;  %v376_v2 = vld [vmem:[#allocation7 + $0x10] sm:$0xff]  ;;  %s271_s10 = scalar_lea.vmem [#allocation8], %s609_s6  ;;  %s623_s13 = sshll.u32 %s1090_s22, 8 }
  0x6c   : > { %1010 = vsyncadd (%p1341_p1), [#allocation6], 4294963200  ;;  %v762_v3 = vpack.c.bf16 %v375_v1, %v374_v0  ;;  %v377_v4 = vld [vmem:[#allocation7 + $0x18] sm:$0xff]  ;;  %v378_v6 = vld [vmem:[#allocation7 + $0x20] sm:$0xff]  ;;  %s508_s28 = sshll.u32 %s271_s10, 4  ;;  %s1279_s11 = scalar_lea.hbm %s1327_s5, %s623_s13  ;;  %s1274_s28 = int_to_ptr.vmem [resolvable:$true] %s508_s28 }
  0x6d   : > { %v766_v5 = vpack.c.bf16 %v377_v4, %v376_v2  ;;  %v379_v7 = vld [vmem:[#allocation7 + $0x28] sm:$0xff]  ;;  %v276_v8 = vld [vmem:[#allocation5] sm:$0xff]  ;;  %v278_v12 = vld [vmem:[#allocation5 + $0x10] sm:$0xff]  ;;  %s495_s17 = scalar_lea.sflag [#allocation4], %s1242_s14  ;;  %s959_s7 = scalar_lea.vmem %s1274_s28, 256 }
  0x6e   : > { %763 = vmatprep.subr.bf16.mxu1 %v762_v3  ;;  %v277_v9 = vld [vmem:[#allocation5 + $0x8] sm:$0xff]  ;;  %v770_v10 = vpack.c.bf16 %v379_v7, %v378_v6  ;;  %v279_v13 = vld [vmem:[#allocation5 + $0x18] sm:$0xff]  ;;  %v380_v14 = vld [vmem:[#allocation7 + $0x30] sm:$0xff]  ;;  %p960_p2 = scmp.ne.s32.totalorder %s1274_s28, %s959_s7  ;;  %s1036_s22 = smov [#allocation8]  }
  0x6f   : > { %765 = vmatpush3.bf16.msra.mxu1 %v762_v3  ;;  %v730_v11 = vpack.c.bf16 %v277_v9, %v276_v8  ;;  %v381_v15 = vld [vmem:[#allocation7 + $0x38] sm:$0xff]  ;;  %v734_v16 = vpack.c.bf16 %v279_v13, %v278_v12  ;;  %v280_v17 = vld [vmem:[#allocation5 + $0x20] sm:$0xff]  ;;  %v281_v18 = vld [vmem:[#allocation5 + $0x28] sm:$0xff]  ;;  %s963_s6 = sshll.u32 %s1036_s22, 4  ;;  %s964_s6 = int_to_ptr.vmem [resolvable:$false] %s963_s6 }
  0x70   : > { %767 = vmatprep.subr.bf16.mxu1 %v766_v5  ;;  %v1259_v19 = vld [vmem:[%s1248_s12] sm:$0xff]  ;;  %v774_v20 = vpack.c.bf16 %v381_v15, %v380_v14  ;;  %v738_v22 = vpack.c.bf16 %v281_v18, %v280_v17  ;;  %v383_v23 = vld [vmem:[#allocation7 + $0x48] sm:$0xff]  ;;  %v283_v25 = vld [vmem:[#allocation5 + $0x38] sm:$0xff]  ;;  %p961_p4 = pnand %p960_p2, %p1187_p6  ;;  %s965_s8 = scalar_lea.vmem %s964_s6, 512 }
  0x71   : > { %731 = vmatprep.subr.bf16.mxu0 %v730_v11  ;;  %v382_v21 = vld [vmem:[#allocation7 + $0x40] sm:$0xff]  ;;  %727 = vmatprep.mubr.f32.mxu1 %v1259_v19  ;;  %v282_v24 = vld [vmem:[#allocation5 + $0x30] sm:$0xff]  ;;  %v385_v29 = vld [vmem:[#allocation7 + $0x58] sm:$0xff]  ;;  %p966_p11 = scmp.lt.s32.totalorder %s1274_s28, %s964_s6  ;;  %p967_p13 = scmp.lt.s32.totalorder %s965_s8, %s959_s7 }
  0x72   : > { %733 = vmatpush3.bf16.msra.mxu0 %v730_v11  ;;  %692 = vmatprep.mubr.f32.mxu0 %v1259_v19  ;;  %v778_v26 = vpack.c.bf16 %v383_v23, %v382_v21  ;;  %v384_v27 = vld [vmem:[#allocation7 + $0x50] sm:$0xff]  ;;  %v742_v28 = vpack.c.bf16 %v283_v25, %v282_v24  ;;  %v284_v30 = vld [vmem:[#allocation5 + $0x40] sm:$0xff]  ;;  %v285_v31 = vld [vmem:[#allocation5 + $0x48] sm:$0xff]  ;;  %p962_p8 = pneg %p961_p4 }
  0x73   : > { %769 = vmatpush3.bf16.msra.mxu1 %v766_v5  ;;  %735 = vmatprep.subr.bf16.mxu0 %v734_v16  ;;  %v782_v32 = vpack.c.bf16 %v385_v29, %v384_v27  ;;  %v386_v33 = vld [vmem:[#allocation7 + $0x60] sm:$0xff]  ;;  %v746_v34 = vpack.c.bf16 %v285_v31, %v284_v30  ;;  %v387_v35 = vld [vmem:[#allocation7 + $0x68] sm:$0xff]  ;;  %v286_v36 = vld [vmem:[#allocation5 + $0x50] sm:$0xff]  ;;  %p968_p3 = por %p967_p13, %p966_p11 }
  0x74   : > { %771 = vmatprep.subr.bf16.mxu1 %v770_v10  ;;  %v287_v37 = vld [vmem:[#allocation5 + $0x58] sm:$0xff]  ;;  %v786_v38 = vpack.c.bf16 %v387_v35, %v386_v33  ;;  %v388_v39 = vld [vmem:[#allocation7 + $0x70] sm:$0xff]  ;;  %v288_v42 = vld [vmem:[#allocation5 + $0x60] sm:$0xff] }
  0x75   : > { %v750_v40 = vpack.c.bf16 %v287_v37, %v286_v36  ;;  %v389_v41 = vld [vmem:[#allocation7 + $0x78] sm:$0xff]  ;;  %v289_v43 = vld [vmem:[#allocation5 + $0x68] sm:$0xff]  ;;  %v290_v46 = vld [vmem:[#allocation5 + $0x70] sm:$0xff]  ;;  %p969_p7 = pnand %p968_p3, %p962_p8 }
  0x76   : > { %737 = vmatpush3.bf16.msra.mxu0 %v734_v16  ;;  %v790_v44 = vpack.c.bf16 %v389_v41, %v388_v39  ;;  %v754_v45 = vpack.c.bf16 %v289_v43, %v288_v42  ;;  %v291_v47 = vld [vmem:[#allocation5 + $0x78] sm:$0xff]  ;;  %v614_v50 = vld [vmem:[%s1326_s4] ss:$0 sm:$0xff] }
  0x77   : > { %773 = vmatpush3.bf16.msra.mxu1 %v770_v10  ;;  %739 = vmatprep.subr.bf16.mxu0 %v738_v22  ;;  %v758_v48 = vpack.c.bf16 %v291_v47, %v290_v46  ;;  %v275_v49 = vld [vmem:[%s1248_s12 + $0x8] sm:$0xff]  ;;  %v613_v59 = vld [vmem:[%s1325_s3] ss:$0 sm:$0xff] }
  0x78   : > { %775 = vmatprep.subr.bf16.mxu1 %v774_v20 }
  0x7a   : > { %741 = vmatpush3.bf16.msra.mxu0 %v738_v22 }
  0x7b   : > { %777 = vmatpush3.bf16.msra.mxu1 %v774_v20  ;;  %743 = vmatprep.subr.bf16.mxu0 %v742_v28 }
  0x7c   : > { %779 = vmatprep.subr.bf16.mxu1 %v778_v26 }
  0x7e   : > { %745 = vmatpush3.bf16.msra.mxu0 %v742_v28 }
  0x7f   : > { %781 = vmatpush3.bf16.msra.mxu1 %v778_v26  ;;  %747 = vmatprep.subr.bf16.mxu0 %v746_v34 }
  0x80   : > { %783 = vmatprep.subr.bf16.mxu1 %v782_v32 }
  0x82   : > { %749 = vmatpush3.bf16.msra.mxu0 %v746_v34 }
  0x83   : > { %785 = vmatpush3.bf16.msra.mxu1 %v782_v32  ;;  %751 = vmatprep.subr.bf16.mxu0 %v750_v40 }
  0x84   : > { %787 = vmatprep.subr.bf16.mxu1 %v786_v38 }
  0x86   : > { %753 = vmatpush3.bf16.msra.mxu0 %v750_v40 }
  0x87   : > { %789 = vmatpush3.bf16.msra.mxu1 %v786_v38  ;;  %755 = vmatprep.subr.bf16.mxu0 %v754_v45 }
  0x88   : > { %791 = vmatprep.subr.bf16.mxu1 %v790_v44 }
  0x8a   : > { %757 = vmatpush3.bf16.msra.mxu0 %v754_v45 }
  0x8b   : > { %793 = vmatpush3.bf16.msra.mxu1 %v790_v44  ;;  %759 = vmatprep.subr.bf16.mxu0 %v758_v48 }
  0x8e   : > { %728 = vmatmul.mubr.f32.vlgmr.msra.gmra.mrb[0].mxu1 %v275_v49  ;;  %761 = vmatpush3.bf16.msra.mxu0 %v758_v48 }
  0x91   : > { %693 = vmatmul.mubr.f32.vlgmr.msra.gmra.mrb[0].mxu0 %v275_v49 }
 0x161   : > { %v729_v51 = vpop.f32.mrb[0].mxu1 }
 0x162   : > { %v469_v52 = vadd.f32 %v729_v51, %v614_v50  ;;  %v463_v53 = vpop.f32.mrb[1].mxu1 }
 0x163   : > { %v464_v54 = vadd.f32 %v614_v50, %v463_v53 }
 0x164   : > { %v616_v55 = vmul.f32 -1.442695, %v469_v52  ;;  %v694_v57 = vpop.f32.mrb[0].mxu0 }
 0x165   : > { %v615_v56 = vmul.f32 -1.442695, %v464_v54  ;;  %v365_v58 = vpop.f32.mrb[1].mxu0  ;;  %v371_v0 = vadd.f32 %v694_v57, %v613_v59 }
 0x166   : > { %865 = vpow2.f32 %v616_v55  ;;  %v366_v1 = vadd.f32 %v613_v59, %v365_v58 }
 0x167   : > { %867 = vpow2.f32 %v615_v56  ;;  %v473_v2 = vmax.f32 %v371_v0, 0.0 }
 0x168   : > { %v472_v3 = vmax.f32 %v366_v1, 0.0 }
 0x169   : > { %v487_v4 = vsub.f32 %v275_v49, %v473_v2 }
 0x16a   : > { %v486_v5 = vsub.f32 %v1259_v19, %v472_v3 }
 0x170   : > { %v866_v60 = vpop.eup %865 }
 0x171   : > { %v868_v61 = vpop.eup %867  ;;  %v481_v62 = vadd.f32 1.0, %v866_v60 }
 0x172   : > { %v480_v63 = vadd.f32 1.0, %v868_v61 }
 0x173   : > { %869 = vrcp.f32 %v481_v62 }
 0x174   : > { %871 = vrcp.f32 %v480_v63 }
 0x17d   : > { %v870_v6 = vpop.eup %869 }
 0x17e   : > { %v872_v7 = vpop.eup %871  ;;  %v489_v8 = vmul.f32 %v870_v6, %v487_v4 }
 0x17f   : > { %v488_v9 = vmul.f32 %v872_v7, %v486_v5 }
 0x180   : > { %v491_v10 = vadd.f32 %v489_v8, %v473_v2 }
 0x181   : > { %v490_v11 = vadd.f32 %v488_v9, %v472_v3 }
 0x182   : > { %493 = vst [vmem:[%s271_s10 + $0x8] sm:$0xff] %v491_v10 }
 0x183   : > { %492 = vst [vmem:[%s271_s10] sm:$0xff] %v490_v11 }
 0x184   : > { %972 = shalt.err (!%p969_p7)
}
 0x185   : > { %s973_s12 = scalar_lea.hbm %s1279_s11, 256  ;;  %s977_s15 = scalar_lea.hbm %s1327_s5, 1024 }
 0x186   : > { %p974_p9 = scmp.ne.s32.totalorder %s1279_s11, %s973_s12  ;;  %p978_p5 = scmp.lt.u32.totalorder %s1279_s11, %s1327_s5 }
 0x187   : > { %p979_p10 = scmp.lt.u32.totalorder %s977_s15, %s973_s12  ;;  %p981_p2 = scmp.lt.u32.totalorder %s973_s12, %s1279_s11 }
 0x188   : > { %p975_p12 = pnand %p974_p9, %p1187_p6 }
 0x189   : > { %p980_p1 = por %p979_p10, %p978_p5 }
 0x18a   : > { %p976_p0 = pneg %p975_p12 }
 0x18b   : > { %p982_p4 = por %p981_p2, %p980_p1 }
 0x18d   : > { %p983_p8 = pnand %p982_p4, %p976_p0 }
 0x18f   : > { %986 = shalt.err (!%p983_p8)
}
 0x190   : > { %s1037_s13 = smov 128   ;;  %s1038_s9 = smov 8  }
 0x191   : > { %804 = dma.vmem_to_hbm [thread:$0]  (%p1187_p6), %s1274_s28, 256, %s1279_s11, %s495_s17, %s1037_s13, %s1037_s13, %s1038_s9  }
 0x192 PF: > { %p826_p11 = scmp.ge.s32.totalorder %s1029_s21, 2  ;;  %s523_s30 = sand.u32 1, %s1017_s18  }
 0x193   : > { %p1342_p13 = scmp.ne.s32.totalorder %s1332_s25, 0  ;;  %s524_s7 = scalar_lea.sflag [#allocation4], %s523_s30 }
 0x195   : > { %p818_p3 = pnand %p826_p11, %p1342_p13 }
 0x197   : > { %1012 = dma.done.wait (!%p818_p3), %s524_s7, 256  }
 0x198   : > { %1014 = vsyncadd (!%p818_p3), %s524_s7, 4294967040  ;;  %p19_p7 = scmp.ge.s32.totalorder %s1177_s29, 6   ;;  %s1343_s18 = smov %s1021_s19 }
 0x199   : > { %s1344_s19 = smov %s1025_s20  ;;  %s1345_s20 = smov %s1193_s27 }
 0x19a   : > { %s1346_s21 = smov %s1177_s29  ;;  %21 = sbr.rel (!%p19_p7) target bundleno = 6 (0x6), region = 93 }
 0x1a1   :  { %529 = vsyncpa [#allocation3], 1 }
 0x1a2   :  { %531 = vsyncpa [#allocation3 + $0x1], 1 }
 0x1a3   :  { %532 = vsyncpa [#allocation6], 1 }
 0x1a4   :  { %533 = vsyncpa [#allocation4], 1 }
 0x1a5   :  { %535 = vsyncpa [#allocation4 + $0x1], 1 }

// kernel: tpu_custom_call.1
= control target key start
LH: loop header
LB: loop body
LE: loop exit
PB: predicated region body
PF: predicated region fallthrough
CT: control target
= control target key end

     0   :  { %10 = vsyncpa [#allocation3], 0  ;;  %s1322_s0 = inlined_call_operand.hbm [shape: f32[64,128], index: 0, kind: input, shape index: {}]   ;;  %s1323_s1 = inlined_call_operand.hbm [shape: f32[128,128], index: 1, kind: input, shape index: {}]   ;;  %s1324_s2 = inlined_call_operand.hbm [shape: f32[128,128], index: 2, kind: input, shape index: {}]   ;;  %s1325_s3 = inlined_call_operand.vmem [shape: f32[1,128], index: 3, kind: input, shape index: {}]   ;;  %s1326_s4 = inlined_call_operand.vmem [shape: f32[1,128], index: 4, kind: input, shape index: {}]   ;;  %s1327_s5 = inlined_call_operand.hbm [shape: f32[64,128], index: 5, kind: output, shape index: {}]  }
   0x1   :  { %12 = vsyncpa [#allocation3 + $0x1], 0 }
   0x2   :  { %13 = vsyncpa [#allocation6], 0 }
   0x3   :  { %14 = vsyncpa [#allocation4], 0 }
   0x4   :  { %16 = vsyncpa [#allocation4 + $0x1], 0  ;;  %s1069_s18 = smov 0   ;;  %s1071_s19 = smov 0  }
   0x5   :  { %s1073_s20 = smov 0   ;;  %s1075_s21 = smov 0  }
   0x6 LB: > { %s1090_s22 = sadd.s32 4294967295, %s1029_s21   ;;  %s600_s23 = sadd.s32 4294967294, %s1029_s21   ;;  %s1029_s21 = sphi %s1075_s21, %s1346_s21   ;;  %s1025_s20 = sphi %s1073_s20, %s1345_s20   ;;  %s1021_s19 = sphi %s1071_s19, %s1344_s19   ;;  %s1017_s18 = sphi %s1069_s18, %s1343_s18  }
   0x7   : > { %p42_p0 = scmp.ne.s32.totalorder %s1021_s19, %s1017_s18  ;;  %p1328_p1 = scmp.eq.s32.totalorder %s1090_s22, 0 }
   0x8   : > { %p156_p3 = scmp.eq.s32.totalorder %s600_s23, 3  ;;  %p601_p5 = scmp.ge.s32.totalorder %s1029_s21, 1 }
   0x9   : > { %p1099_p4 = por %p1328_p1, %p42_p0  ;;  %p163_p7 = scmp.lt.s32.totalorder %s1029_s21, 5 }
   0xa   : > { %p1104_p6 = por %p156_p3, %p42_p0  ;;  %s1031_s27 = smov [#allocation5]  }
   0xb   : > { %s1331_s24 = scalar_select %p1099_p4, 1, 0 }
   0xc   : > { %s1332_s25 = scalar_select %p1104_p6, 1, 0 }
   0xd   : > { %p1109_p8 = pnand %p601_p5, %p163_p7  ;;  %s175_s28 = sshll.u32 %s1031_s27, 4  ;;  %s176_s28 = int_to_ptr.vmem [resolvable:$true] %s175_s28 }
   0xe   : > { %s1032_s30 = smov [#allocation7]   ;;  %s873_s9 = scalar_lea.hbm %s1323_s1, 2048 }
   0xf   : > { %s1333_s26 = scalar_select %p1109_p8, 1, 0 }
  0x10   : > { %p806_p9 = pneg %p1109_p8  ;;  %s188_s6 = sshll.u32 %s1032_s30, 4  ;;  %s1121_s6 = int_to_ptr.vmem [resolvable:$true] %s188_s6 }
  0x11   : > { %p874_p11 = scmp.ne.s32.totalorder %s1323_s1, %s873_s9  ;;  %p880_p3 = scmp.lt.u32.totalorder %s873_s9, %s1323_s1 }
  0x12   : > { %p1117_p10 = pnand %p806_p9, %p1328_p1 }
  0x14   : > { %p875_p12 = pneg %p1117_p10 }
  0x16   : > { %p876_p13 = pnand %p875_p12, %p874_p11 }
  0x18   : > { %p877_p0 = pneg %p876_p13 }
  0x1a   : > { %p882_p5 = pnand %p880_p3, %p877_p0 }
  0x1c   : > { %885 = shalt.err (!%p882_p5)
}
  0x1d   : > { %s886_s14 = scalar_lea.vmem %s176_s28, 2048  ;;  %p894_p2 = scmp.lt.s32.totalorder %s176_s28, %s176_s28 }
  0x1e   : > { %p887_p7 = scmp.ne.s32.totalorder %s176_s28, %s886_s14  ;;  %p895_p6 = scmp.lt.s32.totalorder %s886_s14, %s886_s14 }
  0x20   : > { %p889_p9 = pnand %p887_p7, %p875_p12  ;;  %p896_p4 = por %p895_p6, %p894_p2 }
  0x22   : > { %p890_p1 = pneg %p889_p9 }
  0x24   : > { %p897_p8 = pnand %p896_p4, %p890_p1 }
  0x26   : > { %900 = shalt.err (!%p897_p8)
}
  0x27   : > { %s1033_s15 = smov 128   ;;  %s1034_s16 = smov 8  }
  0x28   : > { %809 = dma.hbm_to_vmem [thread:$0]  (!%p1117_p10), %s1323_s1, 2048, %s176_s28, [#allocation6], %s1033_s15, %s1033_s15, %s1034_s16  }
  0x29   : > { %s901_s7 = scalar_lea.hbm %s1324_s2, 2048 }
  0x2a   : > { %p902_p1 = scmp.ne.s32.totalorder %s1324_s2, %s901_s7  ;;  %p908_p6 = scmp.lt.u32.totalorder %s901_s7, %s1324_s2 }
  0x2c   : > { %p904_p2 = pnand %p902_p1, %p875_p12 }
  0x2e   : > { %p905_p4 = pneg %p904_p2 }
  0x30   : > { %p910_p8 = pnand %p908_p6, %p905_p4 }
  0x32   : > { %913 = shalt.err (!%p910_p8)
}
  0x33   : > { %s914_s28 = scalar_lea.vmem %s1121_s6, 2048  ;;  %p922_p3 = scmp.lt.s32.totalorder %s1121_s6, %s1121_s6 }
  0x34   : > { %p915_p11 = scmp.ne.s32.totalorder %s1121_s6, %s914_s28  ;;  %p923_p5 = scmp.lt.s32.totalorder %s914_s28, %s914_s28 }
  0x36   : > { %p917_p13 = pnand %p915_p11, %p875_p12  ;;  %p924_p7 = por %p923_p5, %p922_p3 }
  0x38   : > { %p918_p0 = pneg %p917_p13 }
  0x3a   : > { %p925_p9 = pnand %p924_p7, %p918_p0 }
  0x3c   : > { %928 = shalt.err (!%p925_p9)
}
  0x3d   : > { %812 = dma.hbm_to_vmem [thread:$0]  (!%p1117_p10), %s1324_s2, 2048, %s1121_s6, [#allocation6], %s1033_s15, %s1033_s15, %s1034_s16  }
  0x3e   : > { %s1177_s29 = sadd.s32 1, %s1029_s21   ;;  %s29_s14 = sadd.s32 1, %s1025_s20 }
  0x3f   : > { %s26_s17 = ssub.s32 %s1029_s21, %s1177_s29  ;;  %p36_p12 = scmp.ne.s32.totalorder %s1025_s20, %s1021_s19 }
  0x40   : > { %p27_p1 = scmp.eq.s32.totalorder %s26_s17, 0  ;;  %p37_p2 = scmp.eq.s32.totalorder %s1029_s21, 0 }
  0x41   : > { %p1335_p4 = scmp.eq.s32.totalorder %s1090_s22, 3  ;;  %p823_p8 = scmp.lt.s32.totalorder %s1029_s21, 4 }
  0x42   : > { %s1193_s27 = scalar_select %p27_p1, %s1025_s20, %s29_s14  }
  0x43   : > { %p1187_p6 = por %p1335_p4, %p36_p12  ;;  %p38_p11 = por %p37_p2, %p36_p12 }
  0x44   : > { %s208_s30 = sand.u32 1, %s1025_s20   ;;  %s622_s6 = sshll.u32 %s1029_s21, 8 }
  0x45   : > { %s605_s7 = sshll.u32 %s208_s30, 4  ;;  %s1200_s10 = scalar_lea.hbm %s1322_s0, %s622_s6 }
  0x46   : > { %s212_s11 = scalar_lea.vmem [#allocation2], %s605_s7  ;;  %p1204_p10 = pnand %p823_p8, %p38_p11 }
  0x47   : > { %s219_s28 = sshll.u32 %s212_s11, 4  ;;  %s1208_s13 = scalar_lea.sflag [#allocation3], %s208_s30  ;;  %s1202_s28 = int_to_ptr.vmem [resolvable:$true] %s219_s28 }
  0x48   : > { %s929_s14 = scalar_lea.hbm %s1200_s10, 256  ;;  %p931_p0 = pneg %p1204_p10 }
  0x49   : > { %p930_p13 = scmp.ne.s32.totalorder %s1200_s10, %s929_s14  ;;  %s934_s6 = scalar_lea.hbm %s1322_s0, 1024 }
  0x4a   : > { %p935_p7 = scmp.lt.u32.totalorder %s1200_s10, %s1322_s0  ;;  %p936_p9 = scmp.lt.u32.totalorder %s934_s6, %s929_s14 }
  0x4b   : > { %p932_p3 = pnand %p931_p0, %p930_p13  ;;  %p938_p1 = scmp.lt.u32.totalorder %s929_s14, %s1200_s10 }
  0x4c   : > { %p937_p12 = por %p936_p9, %p935_p7 }
  0x4d   : > { %p933_p5 = pneg %p932_p3 }
  0x4e   : > { %p939_p2 = por %p938_p1, %p937_p12 }
  0x50   : > { %p940_p4 = pnand %p939_p2, %p933_p5 }
  0x52   : > { %943 = shalt.err (!%p940_p4)
}
  0x53   : > { %s944_s30 = scalar_lea.vmem %s1202_s28, 256  ;;  %s1035_s11 = smov [#allocation2]  }
  0x54   : > { %p945_p8 = scmp.ne.s32.totalorder %s1202_s28, %s944_s30  ;;  %s949_s17 = sshll.u32 %s1035_s11, 4  ;;  %s950_s17 = int_to_ptr.vmem [resolvable:$false] %s949_s17 }
  0x55   : > { %s951_s7 = scalar_lea.vmem %s950_s17, 512  ;;  %p952_p3 = scmp.lt.s32.totalorder %s1202_s28, %s950_s17 }
  0x56   : > { %p947_p11 = pnand %p945_p8, %p931_p0  ;;  %p953_p7 = scmp.lt.s32.totalorder %s951_s7, %s944_s30 }
  0x58   : > { %p948_p13 = pneg %p947_p11  ;;  %p954_p9 = por %p953_p7, %p952_p3 }
  0x5a   : > { %p955_p12 = pnand %p954_p9, %p948_p13 }
  0x5c   : > { %958 = shalt.err (!%p955_p12)
}
  0x5d   : > { %816 = dma.hbm_to_vmem [thread:$0]  (!%p1204_p10), %s1200_s10, 256, %s1202_s28, %s1208_s13, %s1033_s15, %s1033_s15, %s1034_s16  }
  0x5e   : > { %p1338_p0 = scmp.ne.s32.totalorder %s1333_s26, 0 }
  0x5f   : > { %s1242_s14 = sand.u32 (!%p1338_p0), 1, %s1021_s19   ;;  %p1339_p5 = scmp.ne.s32.totalorder (!%p1338_p0), %s1331_s24, 0 }
  0x60   : > { %231 = sbr.rel (%p1338_p0) target bundleno = 402 (0x192), region = 40  ;;  %s609_s6 = sshll.u32 (!%p1338_p0), %s1242_s14, 4 }
  0x61   : > { %s234_s8 = scalar_lea.sflag (!%p1338_p0), [#allocation3], %s1242_s14  ;;  %s1248_s12 = scalar_lea.vmem (!%p1338_p0), [#allocation2], %s609_s6 }
  0x67   : > { %1004 = dma.done.wait (%p1339_p5), %s234_s8, 256  }
  0x68   : > { %1006 = vsyncadd (%p1339_p5), %s234_s8, 4294967040  ;;  %p1340_p10 = scmp.eq.s32.totalorder %s1090_s22, 0 }
  0x6a   : > { %1008 = dma.done.wait (%p1340_p10), [#allocation6], 4096   ;;  %p1341_p1 = pmov %p1340_p10 }
  0x6b   : > { %v374_v0 = vld [vmem:[#allocation7] sm:$0xff]  ;;  %v375_v1 = vld [vmem:[#allocation7 + $0x8] sm:$0xff]  ;;  %v376_v2 = vld [vmem:[#allocation7 + $0x10] sm:$0xff]  ;;  %s271_s10 = scalar_lea.vmem [#allocation8], %s609_s6  ;;  %s623_s13 = sshll.u32 %s1090_s22, 8 }
  0x6c   : > { %1010 = vsyncadd (%p1341_p1), [#allocation6], 4294963200  ;;  %v762_v3 = vpack.c.bf16 %v375_v1, %v374_v0  ;;  %v377_v4 = vld [vmem:[#allocation7 + $0x18] sm:$0xff]  ;;  %v378_v6 = vld [vmem:[#allocation7 + $0x20] sm:$0xff]  ;;  %s508_s28 = sshll.u32 %s271_s10, 4  ;;  %s1279_s11 = scalar_lea.hbm %s1327_s5, %s623_s13  ;;  %s1274_s28 = int_to_ptr.vmem [resolvable:$true] %s508_s28 }
  0x6d   : > { %v766_v5 = vpack.c.bf16 %v377_v4, %v376_v2  ;;  %v379_v7 = vld [vmem:[#allocation7 + $0x28] sm:$0xff]  ;;  %v276_v8 = vld [vmem:[#allocation5] sm:$0xff]  ;;  %v278_v12 = vld [vmem:[#allocation5 + $0x10] sm:$0xff]  ;;  %s495_s17 = scalar_lea.sflag [#allocation4], %s1242_s14  ;;  %s959_s7 = scalar_lea.vmem %s1274_s28, 256 }
  0x6e   : > { %763 = vmatprep.subr.bf16.mxu1 %v762_v3  ;;  %v277_v9 = vld [vmem:[#allocation5 + $0x8] sm:$0xff]  ;;  %v770_v10 = vpack.c.bf16 %v379_v7, %v378_v6  ;;  %v279_v13 = vld [vmem:[#allocation5 + $0x18] sm:$0xff]  ;;  %v380_v14 = vld [vmem:[#allocation7 + $0x30] sm:$0xff]  ;;  %p960_p2 = scmp.ne.s32.totalorder %s1274_s28, %s959_s7  ;;  %s1036_s22 = smov [#allocation8]  }
  0x6f   : > { %765 = vmatpush3.bf16.msra.mxu1 %v762_v3  ;;  %v730_v11 = vpack.c.bf16 %v277_v9, %v276_v8  ;;  %v381_v15 = vld [vmem:[#allocation7 + $0x38] sm:$0xff]  ;;  %v734_v16 = vpack.c.bf16 %v279_v13, %v278_v12  ;;  %v280_v17 = vld [vmem:[#allocation5 + $0x20] sm:$0xff]  ;;  %v281_v18 = vld [vmem:[#allocation5 + $0x28] sm:$0xff]  ;;  %s963_s6 = sshll.u32 %s1036_s22, 4  ;;  %s964_s6 = int_to_ptr.vmem [resolvable:$false] %s963_s6 }
  0x70   : > { %767 = vmatprep.subr.bf16.mxu1 %v766_v5  ;;  %v1259_v19 = vld [vmem:[%s1248_s12] sm:$0xff]  ;;  %v774_v20 = vpack.c.bf16 %v381_v15, %v380_v14  ;;  %v738_v22 = vpack.c.bf16 %v281_v18, %v280_v17  ;;  %v383_v23 = vld [vmem:[#allocation7 + $0x48] sm:$0xff]  ;;  %v283_v25 = vld [vmem:[#allocation5 + $0x38] sm:$0xff]  ;;  %p961_p4 = pnand %p960_p2, %p1187_p6  ;;  %s965_s8 = scalar_lea.vmem %s964_s6, 512 }
  0x71   : > { %731 = vmatprep.subr.bf16.mxu0 %v730_v11  ;;  %v382_v21 = vld [vmem:[#allocation7 + $0x40] sm:$0xff]  ;;  %727 = vmatprep.mubr.f32.mxu1 %v1259_v19  ;;  %v282_v24 = vld [vmem:[#allocation5 + $0x30] sm:$0xff]  ;;  %v385_v29 = vld [vmem:[#allocation7 + $0x58] sm:$0xff]  ;;  %p966_p11 = scmp.lt.s32.totalorder %s1274_s28, %s964_s6  ;;  %p967_p13 = scmp.lt.s32.totalorder %s965_s8, %s959_s7 }
  0x72   : > { %733 = vmatpush3.bf16.msra.mxu0 %v730_v11  ;;  %692 = vmatprep.mubr.f32.mxu0 %v1259_v19  ;;  %v778_v26 = vpack.c.bf16 %v383_v23, %v382_v21  ;;  %v384_v27 = vld [vmem:[#allocation7 + $0x50] sm:$0xff]  ;;  %v742_v28 = vpack.c.bf16 %v283_v25, %v282_v24  ;;  %v284_v30 = vld [vmem:[#allocation5 + $0x40] sm:$0xff]  ;;  %v285_v31 = vld [vmem:[#allocation5 + $0x48] sm:$0xff]  ;;  %p962_p8 = pneg %p961_p4 }
  0x73   : > { %769 = vmatpush3.bf16.msra.mxu1 %v766_v5  ;;  %735 = vmatprep.subr.bf16.mxu0 %v734_v16  ;;  %v782_v32 = vpack.c.bf16 %v385_v29, %v384_v27  ;;  %v386_v33 = vld [vmem:[#allocation7 + $0x60] sm:$0xff]  ;;  %v746_v34 = vpack.c.bf16 %v285_v31, %v284_v30  ;;  %v387_v35 = vld [vmem:[#allocation7 + $0x68] sm:$0xff]  ;;  %v286_v36 = vld [vmem:[#allocation5 + $0x50] sm:$0xff]  ;;  %p968_p3 = por %p967_p13, %p966_p11 }
  0x74   : > { %771 = vmatprep.subr.bf16.mxu1 %v770_v10  ;;  %v287_v37 = vld [vmem:[#allocation5 + $0x58] sm:$0xff]  ;;  %v786_v38 = vpack.c.bf16 %v387_v35, %v386_v33  ;;  %v388_v39 = vld [vmem:[#allocation7 + $0x70] sm:$0xff]  ;;  %v288_v42 = vld [vmem:[#allocation5 + $0x60] sm:$0xff] }
  0x75   : > { %v750_v40 = vpack.c.bf16 %v287_v37, %v286_v36  ;;  %v389_v41 = vld [vmem:[#allocation7 + $0x78] sm:$0xff]  ;;  %v289_v43 = vld [vmem:[#allocation5 + $0x68] sm:$0xff]  ;;  %v290_v46 = vld [vmem:[#allocation5 + $0x70] sm:$0xff]  ;;  %p969_p7 = pnand %p968_p3, %p962_p8 }
  0x76   : > { %737 = vmatpush3.bf16.msra.mxu0 %v734_v16  ;;  %v790_v44 = vpack.c.bf16 %v389_v41, %v388_v39  ;;  %v754_v45 = vpack.c.bf16 %v289_v43, %v288_v42  ;;  %v291_v47 = vld [vmem:[#allocation5 + $0x78] sm:$0xff]  ;;  %v614_v50 = vld [vmem:[%s1326_s4] ss:$0 sm:$0xff] }
  0x77   : > { %773 = vmatpush3.bf16.msra.mxu1 %v770_v10  ;;  %739 = vmatprep.subr.bf16.mxu0 %v738_v22  ;;  %v758_v48 = vpack.c.bf16 %v291_v47, %v290_v46  ;;  %v275_v49 = vld [vmem:[%s1248_s12 + $0x8] sm:$0xff]  ;;  %v613_v59 = vld [vmem:[%s1325_s3] ss:$0 sm:$0xff] }
  0x78   : > { %775 = vmatprep.subr.bf16.mxu1 %v774_v20 }
  0x7a   : > { %741 = vmatpush3.bf16.msra.mxu0 %v738_v22 }
  0x7b   : > { %777 = vmatpush3.bf16.msra.mxu1 %v774_v20  ;;  %743 = vmatprep.subr.bf16.mxu0 %v742_v28 }
  0x7c   : > { %779 = vmatprep.subr.bf16.mxu1 %v778_v26 }
  0x7e   : > { %745 = vmatpush3.bf16.msra.mxu0 %v742_v28 }
  0x7f   : > { %781 = vmatpush3.bf16.msra.mxu1 %v778_v26  ;;  %747 = vmatprep.subr.bf16.mxu0 %v746_v34 }
  0x80   : > { %783 = vmatprep.subr.bf16.mxu1 %v782_v32 }
  0x82   : > { %749 = vmatpush3.bf16.msra.mxu0 %v746_v34 }
  0x83   : > { %785 = vmatpush3.bf16.msra.mxu1 %v782_v32  ;;  %751 = vmatprep.subr.bf16.mxu0 %v750_v40 }
  0x84   : > { %787 = vmatprep.subr.bf16.mxu1 %v786_v38 }
  0x86   : > { %753 = vmatpush3.bf16.msra.mxu0 %v750_v40 }
  0x87   : > { %789 = vmatpush3.bf16.msra.mxu1 %v786_v38  ;;  %755 = vmatprep.subr.bf16.mxu0 %v754_v45 }
  0x88   : > { %791 = vmatprep.subr.bf16.mxu1 %v790_v44 }
  0x8a   : > { %757 = vmatpush3.bf16.msra.mxu0 %v754_v45 }
  0x8b   : > { %793 = vmatpush3.bf16.msra.mxu1 %v790_v44  ;;  %759 = vmatprep.subr.bf16.mxu0 %v758_v48 }
  0x8e   : > { %728 = vmatmul.mubr.f32.vlgmr.msra.gmra.mrb[0].mxu1 %v275_v49  ;;  %761 = vmatpush3.bf16.msra.mxu0 %v758_v48 }
  0x91   : > { %693 = vmatmul.mubr.f32.vlgmr.msra.gmra.mrb[0].mxu0 %v275_v49 }
 0x161   : > { %v729_v51 = vpop.f32.mrb[0].mxu1 }
 0x162   : > { %v469_v52 = vadd.f32 %v729_v51, %v614_v50  ;;  %v463_v53 = vpop.f32.mrb[1].mxu1 }
 0x163   : > { %v464_v54 = vadd.f32 %v614_v50, %v463_v53 }
 0x164   : > { %v616_v55 = vmul.f32 -1.442695, %v469_v52  ;;  %v694_v57 = vpop.f32.mrb[0].mxu0 }
 0x165   : > { %v615_v56 = vmul.f32 -1.442695, %v464_v54  ;;  %v365_v58 = vpop.f32.mrb[1].mxu0  ;;  %v371_v0 = vadd.f32 %v694_v57, %v613_v59 }
 0x166   : > { %865 = vpow2.f32 %v616_v55  ;;  %v366_v1 = vadd.f32 %v613_v59, %v365_v58 }
 0x167   : > { %867 = vpow2.f32 %v615_v56  ;;  %v473_v2 = vmax.f32 %v371_v0, 0.0 }
 0x168   : > { %v472_v3 = vmax.f32 %v366_v1, 0.0 }
 0x169   : > { %v487_v4 = vsub.f32 %v275_v49, %v473_v2 }
 0x16a   : > { %v486_v5 = vsub.f32 %v1259_v19, %v472_v3 }
 0x170   : > { %v866_v60 = vpop.eup %865 }
 0x171   : > { %v868_v61 = vpop.eup %867  ;;  %v481_v62 = vadd.f32 1.0, %v866_v60 }
 0x172   : > { %v480_v63 = vadd.f32 1.0, %v868_v61 }
 0x173   : > { %869 = vrcp.f32 %v481_v62 }
 0x174   : > { %871 = vrcp.f32 %v480_v63 }
 0x17d   : > { %v870_v6 = vpop.eup %869 }
 0x17e   : > { %v872_v7 = vpop.eup %871  ;;  %v489_v8 = vmul.f32 %v870_v6, %v487_v4 }
 0x17f   : > { %v488_v9 = vmul.f32 %v872_v7, %v486_v5 }
 0x180   : > { %v491_v10 = vadd.f32 %v489_v8, %v473_v2 }
 0x181   : > { %v490_v11 = vadd.f32 %v488_v9, %v472_v3 }
 0x182   : > { %493 = vst [vmem:[%s271_s10 + $0x8] sm:$0xff] %v491_v10 }
 0x183   : > { %492 = vst [vmem:[%s271_s10] sm:$0xff] %v490_v11 }
 0x184   : > { %972 = shalt.err (!%p969_p7)
}
 0x185   : > { %s973_s12 = scalar_lea.hbm %s1279_s11, 256  ;;  %s977_s15 = scalar_lea.hbm %s1327_s5, 1024 }
 0x186   : > { %p974_p9 = scmp.ne.s32.totalorder %s1279_s11, %s973_s12  ;;  %p978_p5 = scmp.lt.u32.totalorder %s1279_s11, %s1327_s5 }
 0x187   : > { %p979_p10 = scmp.lt.u32.totalorder %s977_s15, %s973_s12  ;;  %p981_p2 = scmp.lt.u32.totalorder %s973_s12, %s1279_s11 }
 0x188   : > { %p975_p12 = pnand %p974_p9, %p1187_p6 }
 0x189   : > { %p980_p1 = por %p979_p10, %p978_p5 }
 0x18a   : > { %p976_p0 = pneg %p975_p12 }
 0x18b   : > { %p982_p4 = por %p981_p2, %p980_p1 }
 0x18d   : > { %p983_p8 = pnand %p982_p4, %p976_p0 }
 0x18f   : > { %986 = shalt.err (!%p983_p8)
}
 0x190   : > { %s1037_s13 = smov 128   ;;  %s1038_s9 = smov 8  }
 0x191   : > { %804 = dma.vmem_to_hbm [thread:$0]  (%p1187_p6), %s1274_s28, 256, %s1279_s11, %s495_s17, %s1037_s13, %s1037_s13, %s1038_s9  }
 0x192 PF: > { %p826_p11 = scmp.ge.s32.totalorder %s1029_s21, 2  ;;  %s523_s30 = sand.u32 1, %s1017_s18  }
 0x193   : > { %p1342_p13 = scmp.ne.s32.totalorder %s1332_s25, 0  ;;  %s524_s7 = scalar_lea.sflag [#allocation4], %s523_s30 }
 0x195   : > { %p818_p3 = pnand %p826_p11, %p1342_p13 }
 0x197   : > { %1012 = dma.done.wait (!%p818_p3), %s524_s7, 256  }
 0x198   : > { %1014 = vsyncadd (!%p818_p3), %s524_s7, 4294967040  ;;  %p19_p7 = scmp.ge.s32.totalorder %s1177_s29, 6   ;;  %s1343_s18 = smov %s1021_s19 }
 0x199   : > { %s1344_s19 = smov %s1025_s20  ;;  %s1345_s20 = smov %s1193_s27 }
 0x19a   : > { %s1346_s21 = smov %s1177_s29  ;;  %21 = sbr.rel (!%p19_p7) target bundleno = 6 (0x6), region = 93 }
 0x1a1   :  { %529 = vsyncpa [#allocation3], 1 }
 0x1a2   :  { %531 = vsyncpa [#allocation3 + $0x1], 1 }
 0x1a3   :  { %532 = vsyncpa [#allocation6], 1 }
 0x1a4   :  { %533 = vsyncpa [#allocation4], 1 }
 0x1a5   :  { %535 = vsyncpa [#allocation4 + $0x1], 1 }

</bundles_post_ra>
